<compile_context>
chip_gen: v7x
topology: tpu7x:2x2x1
jax: 0.10.0
libtpu: 0.0.40
codegen_flags: <defaults>
</compile_context>

<pallas_src>
import functools

import jax
import jax.numpy as jnp
from jax.experimental import pallas as pl
from jax.experimental.pallas import tpu as pltpu


def _round_up(a, b):
    return (a + b - 1) // b * b


def _sublane(itemsize):
    # Packed-sublane tile height per element size (f32 / bf16 / int8-fp8).
    return {4: 8, 2: 16, 1: 32}.get(itemsize, 8)


def _vmem_plan():
    """Best-effort (buffer_budget_bytes, vmem_limit_bytes) per TPU generation."""
    kind = ""
    try:
        kind = jax.devices()[0].device_kind.lower()
    except Exception:
        pass
    if "v6" in kind:                                        # 128 MiB VMEM, 32 MiB scoped default
        return 32 << 20, 64 << 20
    if "v5" in kind and ("lite" in kind or "5e" in kind):   # v5e: 16 MiB scoped default
        return 12 << 20, 28 << 20
    if "v5" in kind or "v4" in kind or "v3" in kind or "v2" in kind:
        return 32 << 20, 64 << 20
    if "7" in kind:                                         # v7x: only 64 MiB physical per TC
        return 24 << 20, 48 << 20
    return 20 << 20, 40 << 20                               # unknown: safe everywhere


def _choose_tiles(m, n, k, in_itemsize, out_itemsize, budget):
    sub = _sublane(in_itemsize)

    # ---- M tile: no row padding for small/medium M, least-waste otherwise.
    if m <= 512:
        tm = max(sub, _round_up(m, sub))
    else:
        tm = min((512, 256, 128), key=lambda c: (_round_up(m, c) - m, -c))

    # ---- N tile: lane-dense; largest of {512,256,128} dividing the 128-padded
    #      hidden size (never adds extra column padding).
    n_pad = _round_up(n, 128)
    tn = 128
    for c in (512, 256):
        if n_pad % c == 0:
            tn = c
            break

    # ---- K: one full block (no padding, no accumulator) when small enough,
    #      else the largest of {2048,1024} dividing K, else 512 with padding.
    if k <= 2048:
        tk, k_grid = k, 1
    else:
        tk = 512
        for c in (2048, 1024):
            if k % c == 0:
                tk = c
                break
        k_grid = -(-k // tk)

    # ---- Shrink until the double-buffered footprint fits the VMEM budget.
    def footprint(tm_, tn_):
        fb = 2 * tm_ * tk * in_itemsize          # x (double-buffered)
        fb += 2 * tk * tn_ * in_itemsize         # weight (double-buffered)
        fb += 2 * tn_ * 4                        # bias
        fb += 2 * tm_ * tn_ * out_itemsize       # output
        if k_grid > 1:
            fb += tm_ * tn_ * 4                  # f32 accumulator scratch
        return fb

    while footprint(tm, tn) > budget:
        if tn > 128:
            tn //= 2
        elif tm > 128:
            tm = max(128, _round_up(tm // 2, sub))
        else:
            break

    m_pad = _round_up(m, tm)
    k_pad = k if k_grid == 1 else _round_up(k, tk)

    # Keep >= 2 (i,j) tiles for non-trivial problems so v7x's two TensorCores
    # (sharded over the parallel grid axes) both get work.
    if (m_pad // tm) * (n_pad // tn) == 1 and tn >= 256 and m >= 128:
        tn //= 2

    return tm, tn, tk, k_grid, m_pad, n_pad, k_pad


def _nonlinear_kernel_noacc(x_ref, w_ref, b_ref, o_ref, *, activation):
    # x_ref: (tm, K)   w_ref: (K, tn)   b_ref: (1, tn)   o_ref: (tm, tn)
    y = jnp.dot(x_ref[...], w_ref[...], preferred_element_type=jnp.float32)
    y = y + b_ref[...].astype(jnp.float32)
    o_ref[...] = activation(y).astype(o_ref.dtype)


def _nonlinear_kernel_acc(x_ref, w_ref, b_ref, o_ref, acc_ref, *, activation):
    # x_ref: (tm, tk)  w_ref: (tk, tn)  b_ref: (1, tn)  o_ref: (tm, tn)
    kk = pl.program_id(2)

    @pl.when(kk == 0)
    def _():
        acc_ref[...] = jnp.zeros_like(acc_ref)

    acc_ref[...] += jnp.dot(x_ref[...], w_ref[...],
                            preferred_element_type=jnp.float32)

    @pl.when(kk == pl.num_programs(2) - 1)
    def _():
        y = acc_ref[...] + b_ref[...].astype(jnp.float32)
        o_ref[...] = activation(y).astype(o_ref.dtype)


def nonlinear(x, weight, bias, activation=None, *, compute_dtype=None):
    """Pallas equivalent of NonLinear.forward.

    x      : (..., input_size)
    weight : (hidden_size, input_size)   (PyTorch nn.Linear convention)
    bias   : (hidden_size,)
    compute_dtype : optional (e.g. jnp.bfloat16) cast for x/W to hit bf16 MXU
                    peak on v6e/v7x; accumulation stays f32.
    """
    act = (lambda y: y) if activation is None else activation
    if not callable(act):
        raise ValueError("activation must be callable: type={}".format(type(act)))
    # TODO(synk): user-supplied activations must lower through Mosaic; ops like
    # gather / 1-D iota inside the callable will fail at kernel compile time.

    k = x.shape[-1]
    n = weight.shape[0]
    lead = x.shape[:-1]
    out_dtype = x.dtype

    x2 = x.reshape(-1, k)
    m = x2.shape[0]

    # Weight transposed ONCE (wrapper-side, amortized) to (K, N): the kernel
    # runs a plain contraction with lane-dense W tiles along N.
    wt = weight.T
    if compute_dtype is not None:
        x2 = x2.astype(compute_dtype)
        wt = wt.astype(compute_dtype)

    in_itemsize = jnp.dtype(x2.dtype).itemsize
    out_itemsize = jnp.dtype(out_dtype).itemsize

    budget, vmem_limit = _vmem_plan()
    tm, tn, tk, k_grid, m_pad, n_pad, k_pad = _choose_tiles(
        m, n, k, in_itemsize, out_itemsize, budget)

    # ---- zero padding (only when required; zero rows/cols contribute 0) ----
    if m_pad != m or k_pad != k:
        x2 = jnp.pad(x2, ((0, m_pad - m), (0, k_pad - k)))
    if k_pad != k or n_pad != n:
        wt = jnp.pad(wt, ((0, k_pad - k), (0, n_pad - n)))
    b2 = (jnp.pad(bias, (0, n_pad - n)) if n_pad != n else bias).reshape(1, n_pad)

    mt, nt = m_pad // tm, n_pad // tn
    x_bytes = m_pad * k_pad * in_itemsize
    w_bytes = k_pad * n_pad * in_itemsize

    if k_grid == 1:
        # No-accumulator fast path. Choose grid order so the *smaller* operand
        # is the re-streamed one; the other's block index is constant along the
        # inner axis and is DMA'd exactly once ("resident" operand).
        m_major = (x_bytes + w_bytes * mt) <= (x_bytes * nt + w_bytes)
        kernel = functools.partial(_nonlinear_kernel_noacc, activation=act)
        scratch = []
        if m_major:
            grid = (mt, nt)
            x_spec = pl.BlockSpec((tm, k_pad), lambda i, j: (i, 0))
            w_spec = pl.BlockSpec((k_pad, tn), lambda i, j: (0, j))
            b_spec = pl.BlockSpec((1, tn), lambda i, j: (0, j))
            o_spec = pl.BlockSpec((tm, tn), lambda i, j: (i, j))
        else:
            grid = (nt, mt)
            x_spec = pl.BlockSpec((tm, k_pad), lambda j, i: (i, 0))
            w_spec = pl.BlockSpec((k_pad, tn), lambda j, i: (0, j))
            b_spec = pl.BlockSpec((1, tn), lambda j, i: (0, j))
            o_spec = pl.BlockSpec((tm, tn), lambda j, i: (i, j))
        dims = ("parallel", "parallel")
        x_passes, w_passes = (1, mt) if m_major else (nt, 1)
    else:
        kernel = functools.partial(_nonlinear_kernel_acc, activation=act)
        scratch = [pltpu.VMEM((tm, tn), jnp.float32)]
        grid = (mt, nt, k_grid)
        x_spec = pl.BlockSpec((tm, tk), lambda i, j, kx: (i, kx))
        w_spec = pl.BlockSpec((tk, tn), lambda i, j, kx: (kx, j))
        b_spec = pl.BlockSpec((1, tn), lambda i, j, kx: (0, j))
        o_spec = pl.BlockSpec((tm, tn), lambda i, j, kx: (i, j))
        dims = ("parallel", "parallel", "arbitrary")
        x_passes, w_passes = nt, mt

    # ---- truthful cost hint (actually streamed bytes) for the XLA scheduler.
    cost = pl.CostEstimate(
        flops=2 * m * k * n,
        transcendentals=(m * n) if activation is not None else 0,
        bytes_accessed=(x_bytes * x_passes + w_bytes * w_passes
                        + n_pad * 4 + m_pad * n_pad * out_itemsize),
    )

    out = pl.pallas_call(
        kernel,
        out_shape=jax.ShapeDtypeStruct((m_pad, n_pad), out_dtype),
        grid_spec=pltpu.PrefetchScalarGridSpec(
            num_scalar_prefetch=0,
            grid=grid,
            in_specs=[x_spec, w_spec, b_spec],
            out_specs=o_spec,
            scratch_shapes=scratch,
        ),
        compiler_params=pltpu.CompilerParams(
            dimension_semantics=dims,
            vmem_limit_bytes=vmem_limit,
        ),
        cost_estimate=cost,
    )(x2, wt, b2)

    return out[:m, :n].reshape(*lead, n)


if __name__ == "__main__":
    # ---- Case A: small shapes matching the module defaults ------------------
    input_size = 32
    hidden_size = 64
    batch, seq = 2, 8

    key = jax.random.PRNGKey(0)
    kx, kw, kb = jax.random.split(key, 3)

    # PyTorch nn.Linear default init: U(-1/sqrt(in), 1/sqrt(in)).
    bound = 1.0 / (input_size ** 0.5)
    weight = jax.random.uniform(kw, (hidden_size, input_size),
                                minval=-bound, maxval=bound, dtype=jnp.float32)
    bias = jax.random.uniform(kb, (hidden_size,),
                              minval=-bound, maxval=bound, dtype=jnp.float32)
    x = jax.random.normal(kx, (batch, seq, input_size), dtype=jnp.float32)

    y_id = nonlinear(x, weight, bias, activation=None)       # identity (module default)
    y_tanh = nonlinear(x, weight, bias, activation=jnp.tanh)  # callable activation
    jax.block_until_ready((y_id, y_tanh))

    ref_lin = x @ weight.T + bias
    assert y_id.shape == (batch, seq, hidden_size)
    assert jnp.allclose(y_id, ref_lin, atol=1e-5, rtol=1e-5)
    assert jnp.allclose(y_tanh, jnp.tanh(ref_lin), atol=1e-5, rtol=1e-5)

    # ---- Case B: large-K layer exercising the tiled-K accumulator path ------
    k_big, n_big = 3000, 128
    kk1, kk2 = jax.random.split(jax.random.PRNGKey(1))
    w_big = jax.random.uniform(kk1, (n_big, k_big), minval=-0.02, maxval=0.02,
                               dtype=jnp.float32)
    b_big = jnp.zeros((n_big,), dtype=jnp.float32)
    x_big = jax.random.normal(kk2, (batch, seq, k_big), dtype=jnp.float32)

    y_big = nonlinear(x_big, w_big, b_big, activation=None)
    jax.block_until_ready(y_big)
    ref_big = x_big @ w_big.T + b_big
    assert y_big.shape == (batch, seq, n_big)
    assert jnp.allclose(y_big, ref_big, atol=1e-2, rtol=1e-2)

    print("KERNEL_OK")
</pallas_src>

<mosaic_0001>
module attributes {stable_mosaic.version = 11 : i64} {
  func.func @_nonlinear_kernel_noacc(%arg0: i32, %arg1: i32, %arg2: memref<16x32xf32, #tpu.memory_space<vmem>>, %arg3: memref<32x128xf32, #tpu.memory_space<vmem>>, %arg4: memref<1x128xf32, #tpu.memory_space<vmem>>, %arg5: memref<16x128xf32, #tpu.memory_space<vmem>>) attributes {dimension_semantics = [#tpu.dimension_semantics<parallel>, #tpu.dimension_semantics<parallel>], iteration_bounds = array<i64: 1, 1>, scalar_prefetch = 0 : i64, scratch_operands = 0 : i64, tpu.core_type = #tpu.core_type<tc>, window_params = [{transform_indices = @transform_0, window_bounds = array<i64: 16, 32>}, {transform_indices = @transform_1, window_bounds = array<i64: 32, 128>}, {transform_indices = @transform_2, window_bounds = array<i64: 1, 128>}, {transform_indices = @transform_3, window_bounds = array<i64: 16, 128>}]} {
    %c0 = arith.constant 0 : index
    %c0_0 = arith.constant 0 : index
    %0 = vector.load %arg2[%c0, %c0_0] : memref<16x32xf32, #tpu.memory_space<vmem>>, vector<16x32xf32>
    %c0_1 = arith.constant 0 : index
    %c0_2 = arith.constant 0 : index
    %1 = vector.load %arg3[%c0_1, %c0_2] : memref<32x128xf32, #tpu.memory_space<vmem>>, vector<32x128xf32>
    %cst = arith.constant dense<0.000000e+00> : vector<16x128xf32>
    %2 = tpu.matmul %0, %1, %cst {dimension_numbers = #tpu.dot_dimension_numbers<[1], [0], [0], [1], [0, 0, 1, 1], [], []>} : vector<16x32xf32>, vector<32x128xf32>, vector<16x128xf32> -> vector<16x128xf32>
    %c0_3 = arith.constant 0 : index
    %c0_4 = arith.constant 0 : index
    %3 = vector.load %arg4[%c0_3, %c0_4] : memref<1x128xf32, #tpu.memory_space<vmem>>, vector<1x128xf32>
    %4 = vector.broadcast %3 : vector<1x128xf32> to vector<16x128xf32>
    %5 = arith.addf %2, %4 : vector<16x128xf32>
    %c0_5 = arith.constant 0 : index
    %c0_6 = arith.constant 0 : index
    %6 = vector.load %arg5[%c0_5, %c0_6] : memref<16x128xf32, #tpu.memory_space<vmem>>, vector<16x128xf32>
    tpu.vector_store %arg5[%c0_5, %c0_6], %5 {strides = array<i32>} : memref<16x128xf32, #tpu.memory_space<vmem>>, vector<16x128xf32>,
    return
  }
  func.func @transform_0(%arg0: i32, %arg1: i32) -> (i32, i32) {
    %c0_i32 = arith.constant 0 : i32
    %c0_i32_0 = arith.constant 0 : i32
    return %arg0, %c0_i32 : i32, i32
  }
  func.func @transform_1(%arg0: i32, %arg1: i32) -> (i32, i32) {
    %c0_i32 = arith.constant 0 : i32
    %c0_i32_0 = arith.constant 0 : i32
    return %c0_i32, %arg1 : i32, i32
  }
  func.func @transform_2(%arg0: i32, %arg1: i32) -> (i32, i32) {
    %c0_i32 = arith.constant 0 : i32
    %c0_i32_0 = arith.constant 0 : i32
    return %c0_i32, %arg1 : i32, i32
  }
  func.func @transform_3(%arg0: i32, %arg1: i32) -> (i32, i32) {
    %c0_i32 = arith.constant 0 : i32
    return %arg0, %arg1 : i32, i32
  }
}

</mosaic_0001>

<bundles_post_ra>
// kernel: tpu_custom_call.1
= control target key start
LH: loop header
LB: loop body
LE: loop exit
PB: predicated region body
PF: predicated region fallthrough
CT: control target
= control target key end

     0   :  { %8 = vsyncpa [#allocation3], 0  ;;  %s336_s0 = inlined_call_operand.hbm [shape: f32[16,32], index: 0, kind: input, shape index: {}]   ;;  %s337_s1 = inlined_call_operand.hbm [shape: f32[32,128], index: 1, kind: input, shape index: {}]   ;;  %s338_s2 = inlined_call_operand.vmem [shape: f32[1,128], index: 2, kind: input, shape index: {}]   ;;  %s339_s3 = inlined_call_operand.hbm [shape: f32[16,128], index: 3, kind: output, shape index: {}]  }
   0x1   :  { %9 = vsyncpa [#allocation6], 0 }
   0x2   :  { %10 = vsyncpa [#allocation4], 0  ;;  %s263_s12 = smov [#allocation2]   ;;  %s191_s16 = scalar_lea.hbm %s336_s0, 256 }
   0x3   :  { %s16_s13 = sshll.u32 %s263_s12, 4  ;;  %p192_p0 = scmp.ne.s32.totalorder %s336_s0, %s191_s16  ;;  %s17_s13 = int_to_ptr.vmem [resolvable:$true] %s16_s13 }
   0x4   :  { %p195_p1 = scmp.lt.u32.totalorder %s191_s16, %s336_s0 }
   0x6   :  { %p197_p2 = pnand %p195_p1, %p192_p0 }
   0x8   :  { %200 = shalt.err (!%p197_p2)
}
   0x9   :  { %s201_s21 = scalar_lea.vmem %s17_s13, 256  ;;  %p206_p4 = scmp.lt.s32.totalorder %s17_s13, %s17_s13 }
   0xa   :  { %p202_p3 = scmp.ne.s32.totalorder %s17_s13, %s201_s21  ;;  %p207_p5 = scmp.lt.s32.totalorder %s201_s21, %s201_s21 }
   0xc   :  { %p208_p6 = por %p207_p5, %p206_p4 }
   0xe   :  { %p209_p7 = pnand %p208_p6, %p202_p3 }
  0x10   :  { %212 = shalt.err (!%p209_p7)
}
  0x11   :  { %s264_s22 = smov 128   ;;  %s265_s23 = smov 8  }
  0x12   :  { %22 = dma.hbm_to_vmem [thread:$0]  %s336_s0, 256, %s17_s13, [#allocation3], %s264_s22, %s264_s22, %s265_s23  }
  0x13   :  { %s266_s26 = smov [#allocation5]   ;;  %s213_s30 = scalar_lea.hbm %s337_s1, 512 }
  0x14   :  { %s28_s27 = sshll.u32 %s266_s26, 4  ;;  %p214_p8 = scmp.ne.s32.totalorder %s337_s1, %s213_s30  ;;  %s29_s27 = int_to_ptr.vmem [resolvable:$true] %s28_s27 }
  0x15   :  { %p217_p9 = scmp.lt.u32.totalorder %s213_s30, %s337_s1 }
  0x17   :  { %p219_p10 = pnand %p217_p9, %p214_p8 }
  0x19   :  { %222 = shalt.err (!%p219_p10)
}
  0x1a   :  { %s223_s8 = scalar_lea.vmem %s29_s27, 512  ;;  %p228_p12 = scmp.lt.s32.totalorder %s29_s27, %s29_s27 }
  0x1b   :  { %p224_p11 = scmp.ne.s32.totalorder %s29_s27, %s223_s8  ;;  %p229_p13 = scmp.lt.s32.totalorder %s223_s8, %s223_s8 }
  0x1d   :  { %p230_p0 = por %p229_p13, %p228_p12 }
  0x1f   :  { %p231_p1 = pnand %p230_p0, %p224_p11 }
  0x21   :  { %234 = shalt.err (!%p231_p1)
}
  0x22   :  { %34 = dma.hbm_to_vmem [thread:$0]  %s337_s1, 512, %s29_s27, [#allocation6], %s264_s22, %s264_s22, %s265_s23  }
  0x23   :  { %257 = dma.done.wait [#allocation3], 256  }
  0x24   :  { %258 = vsyncadd [#allocation3], 4294967040 }
  0x25   :  { %259 = dma.done.wait [#allocation6], 512  }
  0x26   :  { %260 = vsyncadd [#allocation6], 4294966784  ;;  %vm56_vm0 = vcmask 261120   ;;  %v45_v0 = vld [vmem:[#allocation5] sm:$0xff]  ;;  %v46_v1 = vld [vmem:[#allocation5 + $0x8] sm:$0xff]  ;;  %s267_s11 = smov [#allocation7]  }
  0x27   :  { %v47_v2 = vld [vmem:[#allocation5 + $0x10] sm:$0xff]  ;;  %v178_v3 = vpack.c.bf16 %v46_v1, %v45_v0  ;;  %v48_v4 = vld [vmem:[#allocation5 + $0x18] sm:$0xff]  ;;  %s145_s12 = sshll.u32 %s267_s11, 4  ;;  %s146_s12 = int_to_ptr.vmem [resolvable:$true] %s145_s12 }
  0x28   :  { %v43_v5 = vld [vmem:[#allocation2] sm:$0xff]  ;;  %v182_v6 = vpack.c.bf16 %v48_v4, %v47_v2  ;;  %v44_v7 = vld [vmem:[#allocation2 + $0x8] sm:$0xff]  ;;  %s235_s13 = scalar_lea.vmem %s146_s12, 256  ;;  %p240_p3 = scmp.lt.s32.totalorder %s146_s12, %s146_s12 }
  0x29   :  { %175 = vmatprep.mubr.msk.f32.mxu0 %vm56_vm0, %v43_v5  ;;  %179 = vmatprep.subr.bf16.mxu0 %v178_v3  ;;  %v158_v8 = vld [vmem:[%s338_s2] ss:$0 sm:$0xff]  ;;  %p236_p2 = scmp.ne.s32.totalorder %s146_s12, %s235_s13  ;;  %p241_p4 = scmp.lt.s32.totalorder %s235_s13, %s235_s13 }
  0x2a   :  { %181 = vmatpush3.bf16.msra.mxu0 %v178_v3 }
  0x2b   :  { %183 = vmatprep.subr.bf16.mxu0 %v182_v6  ;;  %p242_p5 = por %p241_p4, %p240_p3 }
  0x2d   :  { %p243_p6 = pnand %p242_p5, %p236_p2 }
  0x2e   :  { %185 = vmatpush3.bf16.msra.mxu0 %v182_v6 }
  0x31   :  { %176 = vmatmul.mubr.msk.f32.vlgmr.msra.gmra.mrb[0].mxu0 %vm56_vm0, %v44_v7 }
 0x104   :  { %v177_v9 = vpop.f32.mrb[0].mxu0 }
 0x105   :  { %v135_v10 = vadd.f32 %v177_v9, %v158_v8  ;;  %v129_v11 = vpop.f32.mrb[1].mxu0 }
 0x106   :  { %v130_v12 = vadd.f32 %v158_v8, %v129_v11 }
 0x107   :  { %139 = vst [vmem:[#allocation7 + $0x8] sm:$0xff] %v135_v10 }
 0x108   :  { %138 = vst [vmem:[#allocation7] sm:$0xff] %v130_v12 }
 0x109   :  { %246 = shalt.err (!%p243_p6)
}
 0x10a   :  { %s247_s2 = scalar_lea.hbm %s339_s3, 256 }
 0x10b   :  { %p248_p7 = scmp.ne.s32.totalorder %s339_s3, %s247_s2  ;;  %p251_p8 = scmp.lt.u32.totalorder %s247_s2, %s339_s3 }
 0x10d   :  { %p253_p9 = pnand %p251_p8, %p248_p7 }
 0x10f   :  { %256 = shalt.err (!%p253_p9)
}
 0x110   :  { %151 = dma.vmem_to_hbm [thread:$0]  %s146_s12, 256, %s339_s3, [#allocation4], %s264_s22, %s264_s22, %s265_s23  }
 0x111   :  { %261 = dma.done.wait [#allocation4], 256  }
 0x112   :  { %262 = vsyncadd [#allocation4], 4294967040 }
 0x113   :  { %155 = vsyncpa [#allocation3], 1 }
 0x114   :  { %156 = vsyncpa [#allocation6], 1 }
 0x115   :  { %157 = vsyncpa [#allocation4], 1 }

</bundles_post_ra>
